<compile_context>
chip_gen: v7x
topology: tpu7x:2x2x1
jax: 0.10.0
libtpu: 0.0.40
codegen_flags: <defaults>
</compile_context>

<pallas_src>
import functools

import jax
import jax.numpy as jnp
from jax.experimental import pallas as pl
from jax.experimental.pallas import tpu as pltpu


# ----------------------------------------------------------------------------
# Fused Pallas kernel.  Grid = (B, N // TN, num_rel); R is the reduction axis.
# ----------------------------------------------------------------------------
def _rgcn_kernel(adj_ref, text_ref, w_ref, b_ref, o_ref, acc_ref):
    # adj_ref : (TN, N)       adjacency row tile for (b, r)   [bf16 or f32]
    # text_ref: (N, In)       features for batch b            [f32]
    # w_ref   : (In, Out)     W[r]                            [f32]
    # b_ref   : (1, Out)      bias                            [f32]
    # o_ref   : (TN, Out)     output row tile for (b, t)      [f32]
    # acc_ref : (TN, Out)     f32 VMEM accumulator (persistent across r)
    r = pl.program_id(2)
    num_rel = pl.num_programs(2)

    @pl.when(r == 0)
    def _init():
        acc_ref[...] = jnp.zeros_like(acc_ref)

    a = adj_ref[...]                        # (TN, N)
    text = text_ref[...]                    # (N, In)
    w_r = w_ref[...]                        # (In, Out)
    n = a.shape[1]
    in_dim, out_dim = w_r.shape

    # Row sums on the MXU with f32 accumulation (exact even for bf16 adjacency,
    # and remains correct if the contraction dim is ever tiled).
    ones_col = jnp.ones((n, 1), dtype=a.dtype)
    rowsum = jnp.dot(a, ones_col, preferred_element_type=jnp.float32)   # (TN, 1)
    r_inv = jnp.where(rowsum == 0.0, 0.0, 1.0 / rowsum)                 # inf -> 0

    a_f32 = a.astype(jnp.float32)           # keep MXU math in f32 (module semantics)

    if out_dim >= in_dim:
        # Re-associated order: everything stays Out-lane-dense.
        tw = jnp.dot(text, w_r, preferred_element_type=jnp.float32)     # (N, Out)
        part = jnp.dot(a_f32, tw, preferred_element_type=jnp.float32)   # (TN, Out)
    else:
        # Out < In: the (TN, In) intermediate is the denser one; keep orig order.
        hidden = jnp.dot(a_f32, text, preferred_element_type=jnp.float32)   # (TN, In)
        part = jnp.dot(hidden, w_r, preferred_element_type=jnp.float32)     # (TN, Out)

    # Normalize AFTER the matmul: diag(r_inv) @ adj commutes with right-multiply.
    acc_ref[...] += r_inv * part

    @pl.when(r == num_rel - 1)
    def _finalize():
        o_ref[...] = (acc_ref[...] + b_ref[...]).astype(o_ref.dtype)


def _pick_row_tile(n, preferred):
    """Largest candidate row tile that divides n and is sublane (8) aligned."""
    for cand in (preferred, 512, 256, 128, 64, 32, 16, 8):
        if 0 < cand <= n and n % cand == 0 and cand % 8 == 0:
            return cand
    return n  # single full-height tile (block == full dim is always legal)


# ----------------------------------------------------------------------------
# Wrapper
# ----------------------------------------------------------------------------
def relational_graph_conv(text, adj, weight, bias=None, *, row_tile=128,
                          stream_adj_bf16=True):
    """text: (B, N, In), adj: (B, R, N, N), weight: (R, In, Out), bias: (Out,)
    -> (B, N, Out) float32."""
    B, N, in_dim = text.shape
    _, num_rel, _, _ = adj.shape
    out_dim = weight.shape[-1]

    tn = _pick_row_tile(N, row_tile)
    n_row_tiles = N // tn

    # Stream the adjacency as bf16 (exact for binary 0/1 graphs) to halve HBM
    # traffic on the dominant input; set stream_adj_bf16=False for weighted
    # (non-binary) adjacencies that must stay exact f32.
    adj_in = adj.astype(jnp.bfloat16) if stream_adj_bf16 else adj

    if bias is None:
        bias = jnp.zeros((out_dim,), jnp.float32)
    b2d = bias.reshape(1, out_dim).astype(jnp.float32)

    return pl.pallas_call(
        _rgcn_kernel,
        out_shape=jax.ShapeDtypeStruct((B, N, out_dim), jnp.float32),
        grid=(B, n_row_tiles, num_rel),
        in_specs=[
            # adjacency row tile for (b, r): (TN, N)
            pl.BlockSpec((None, None, tn, N), lambda b, t, r: (b, r, t, 0)),
            # full feature block for batch b: (N, In)
            pl.BlockSpec((None, N, in_dim), lambda b, t, r: (b, 0, 0)),
            # per-relation weight slab, leading-axis indexed: (In, Out)
            pl.BlockSpec((None, in_dim, out_dim), lambda b, t, r: (r, 0, 0)),
            # bias, constant across the grid
            pl.BlockSpec((1, out_dim), lambda b, t, r: (0, 0)),
        ],
        out_specs=pl.BlockSpec((None, tn, out_dim), lambda b, t, r: (b, t, 0)),
        scratch_shapes=[pltpu.VMEM((tn, out_dim), jnp.float32)],
        compiler_params=pltpu.CompilerParams(
            dimension_semantics=("parallel", "parallel", "arbitrary"),
            vmem_limit_bytes=48 * 1024 * 1024,   # safe on v7x's 64 MiB, plenty elsewhere
        ),
    )(adj_in, text, weight, b2d)


# ----------------------------------------------------------------------------
# Pure-JAX reference (mirrors the PyTorch module exactly)
# ----------------------------------------------------------------------------
def relational_graph_conv_ref(text, adj, weight, bias):
    num_rel = adj.shape[1]
    in_dim = text.shape[-1]
    out_dim = weight.shape[-1]

    rowsum = adj.sum(axis=-1, keepdims=True)                  # (B, R, N, 1)
    r_inv = jnp.where(rowsum == 0.0, 0.0, 1.0 / rowsum)
    a_norm = adj * r_inv                                      # diag(r_inv) @ adj
    supports = [a_norm[:, r] @ text for r in range(num_rel)]  # each (B, N, In)
    tmp = jnp.concatenate(supports, axis=-1)                  # (B, N, R*In)
    w2d = weight.reshape(num_rel * in_dim, out_dim)
    return tmp @ w2d + bias


# ----------------------------------------------------------------------------
# Demo / self-check
# ----------------------------------------------------------------------------
if __name__ == "__main__":
    B, num_rel, N = 2, 3, 32
    input_size, output_size = 32, 128        # Out multiple of 128 -> lane-dense stores

    root = jax.random.PRNGKey(0)
    k_text, k_adj, k_w, k_b = jax.random.split(root, 4)

    text = jax.random.normal(k_text, (B, N, input_size), jnp.float32)
    # Binary adjacency; zero out one row per relation to exercise the inf->0 path.
    adj = (jax.random.uniform(k_adj, (B, num_rel, N, N)) > 0.5).astype(jnp.float32)
    adj = adj.at[:, :, 0, :].set(0.0)

    weight = 0.1 * jax.random.normal(k_w, (num_rel, input_size, output_size), jnp.float32)
    bias = 0.1 * jax.random.normal(k_b, (output_size,), jnp.float32)

    # row_tile=16 -> two row tiles per batch element, so the (B, row_tiles, R)
    # grid and the r-accumulation scratch path are actually exercised.
    fwd = jax.jit(functools.partial(relational_graph_conv, row_tile=16))
    out = fwd(text, adj, weight, bias)
    jax.block_until_ready(out)

    ref = relational_graph_conv_ref(text, adj, weight, bias)

    assert out.shape == (B, N, output_size)
    err = float(jnp.max(jnp.abs(out - ref)))
    # Loose-ish tolerance: the XLA reference's default f32 matmul precision on
    # TPU may use bf16 MXU passes while the kernel accumulates in f32.
    assert err < 1e-2, f"max abs err = {err}"
    print("KERNEL_OK")
</pallas_src>

<mosaic_0001>
module attributes {stable_mosaic.version = 11 : i64} {
  func.func @_rgcn_kernel(%arg0: i32, %arg1: i32, %arg2: i32, %arg3: memref<1x1x16x32xbf16, #tpu.memory_space<vmem>>, %arg4: memref<1x32x32xf32, #tpu.memory_space<vmem>>, %arg5: memref<1x32x128xf32, #tpu.memory_space<vmem>>, %arg6: memref<1x128xf32, #tpu.memory_space<vmem>>, %arg7: memref<1x16x128xf32, #tpu.memory_space<vmem>>, %arg8: memref<16x128xf32, #tpu.memory_space<vmem>>) attributes {dimension_semantics = [#tpu.dimension_semantics<parallel>, #tpu.dimension_semantics<parallel>, #tpu.dimension_semantics<arbitrary>], iteration_bounds = array<i64: 2, 2, 3>, scalar_prefetch = 0 : i64, scratch_operands = 1 : i64, tpu.core_type = #tpu.core_type<tc>, window_params = [{transform_indices = @transform_0, window_bounds = array<i64: 1, 1, 16, 32>}, {transform_indices = @transform_1, window_bounds = array<i64: 1, 32, 32>}, {transform_indices = @transform_2, window_bounds = array<i64: 1, 32, 128>}, {pipeline_mode = #tpu.pipeline_mode<synchronous>, transform_indices = @transform_3, window_bounds = array<i64: 1, 128>}, {transform_indices = @transform_4, window_bounds = array<i64: 1, 16, 128>}]} {
    %c0_i32 = arith.constant 0 : i32
    %0 = arith.cmpi eq, %arg2, %c0_i32 : i32
    %1 = arith.extui %0 : i1 to i32
    %c0_i32_0 = arith.constant 0 : i32
    %2 = arith.cmpi ne, %1, %c0_i32_0 : i32
    scf.if %2 {
      %cst_21 = arith.constant 0.000000e+00 : f32
      %28 = vector.broadcast %cst_21 : f32 to vector<16x128xf32>
      %c0_22 = arith.constant 0 : index
      %c0_23 = arith.constant 0 : index
      %29 = vector.load %arg8[%c0_22, %c0_23] : memref<16x128xf32, #tpu.memory_space<vmem>>, vector<16x128xf32>
      tpu.vector_store %arg8[%c0_22, %c0_23], %28 {strides = array<i32>} : memref<16x128xf32, #tpu.memory_space<vmem>>, vector<16x128xf32>,
    } else {
    }
    %c0 = arith.constant 0 : index
    %c0_1 = arith.constant 0 : index
    %c0_2 = arith.constant 0 : index
    %c0_3 = arith.constant 0 : index
    %3 = vector.load %arg3[%c0, %c0_1, %c0_2, %c0_3] : memref<1x1x16x32xbf16, #tpu.memory_space<vmem>>, vector<1x1x16x32xbf16>
    %4 = vector.shape_cast %3 : vector<1x1x16x32xbf16> to vector<16x32xbf16>
    %c0_4 = arith.constant 0 : index
    %c0_5 = arith.constant 0 : index
    %c0_6 = arith.constant 0 : index
    %5 = vector.load %arg4[%c0_4, %c0_5, %c0_6] : memref<1x32x32xf32, #tpu.memory_space<vmem>>, vector<1x32x32xf32>
    %6 = vector.shape_cast %5 : vector<1x32x32xf32> to vector<32x32xf32>
    %c0_7 = arith.constant 0 : index
    %c0_8 = arith.constant 0 : index
    %c0_9 = arith.constant 0 : index
    %7 = vector.load %arg5[%c0_7, %c0_8, %c0_9] : memref<1x32x128xf32, #tpu.memory_space<vmem>>, vector<1x32x128xf32>
    %8 = vector.shape_cast %7 : vector<1x32x128xf32> to vector<32x128xf32>
    %cst = arith.constant 1.000000e+00 : bf16
    %9 = vector.broadcast %cst : bf16 to vector<32x1xbf16>
    %cst_10 = arith.constant dense<0.000000e+00> : vector<16x1xf32>
    %10 = tpu.matmul %4, %9, %cst_10 {dimension_numbers = #tpu.dot_dimension_numbers<[1], [0], [0], [1], [0, 0, 1, 1], [], []>} : vector<16x32xbf16>, vector<32x1xbf16>, vector<16x1xf32> -> vector<16x1xf32>
    %cst_11 = arith.constant 0.000000e+00 : f32
    %11 = vector.broadcast %cst_11 : f32 to vector<16x1xf32>
    %12 = arith.cmpf oeq, %10, %11 : vector<16x1xf32>
    %cst_12 = arith.constant 1.000000e+00 : f32
    %13 = vector.broadcast %cst_12 : f32 to vector<16x1xf32>
    %14 = arith.divf %13, %10 : vector<16x1xf32>
    %cst_13 = arith.constant 0.000000e+00 : f32
    %15 = vector.broadcast %cst_13 : f32 to vector<16x1xf32>
    %16 = arith.select %12, %15, %14 : vector<16x1xi1>, vector<16x1xf32>
    %17 = arith.extf %4 : vector<16x32xbf16> to vector<16x32xf32>
    %cst_14 = arith.constant dense<0.000000e+00> : vector<32x128xf32>
    %18 = tpu.matmul %6, %8, %cst_14 {dimension_numbers = #tpu.dot_dimension_numbers<[1], [0], [0], [1], [0, 0, 1, 1], [], []>} : vector<32x32xf32>, vector<32x128xf32>, vector<32x128xf32> -> vector<32x128xf32>
    %cst_15 = arith.constant dense<0.000000e+00> : vector<16x128xf32>
    %19 = tpu.matmul %17, %18, %cst_15 {dimension_numbers = #tpu.dot_dimension_numbers<[1], [0], [0], [1], [0, 0, 1, 1], [], []>} : vector<16x32xf32>, vector<32x128xf32>, vector<16x128xf32> -> vector<16x128xf32>
    %c0_16 = arith.constant 0 : index
    %c0_17 = arith.constant 0 : index
    %20 = vector.load %arg8[%c0_16, %c0_17] : memref<16x128xf32, #tpu.memory_space<vmem>>, vector<16x128xf32>
    %21 = vector.broadcast %16 : vector<16x1xf32> to vector<16x128xf32>
    %22 = arith.mulf %21, %19 : vector<16x128xf32>
    %23 = arith.addf %20, %22 : vector<16x128xf32>
    %c0_18 = arith.constant 0 : index
    %c0_19 = arith.constant 0 : index
    %24 = vector.load %arg8[%c0_18, %c0_19] : memref<16x128xf32, #tpu.memory_space<vmem>>, vector<16x128xf32>
    tpu.vector_store %arg8[%c0_18, %c0_19], %23 {strides = array<i32>} : memref<16x128xf32, #tpu.memory_space<vmem>>, vector<16x128xf32>,
    %c2_i32 = arith.constant 2 : i32
    %25 = arith.cmpi eq, %arg2, %c2_i32 : i32
    %26 = arith.extui %25 : i1 to i32
    %c0_i32_20 = arith.constant 0 : i32
    %27 = arith.cmpi ne, %26, %c0_i32_20 : i32
    scf.if %27 {
      %c0_21 = arith.constant 0 : index
      %c0_22 = arith.constant 0 : index
      %28 = vector.load %arg8[%c0_21, %c0_22] : memref<16x128xf32, #tpu.memory_space<vmem>>, vector<16x128xf32>
      %c0_23 = arith.constant 0 : index
      %c0_24 = arith.constant 0 : index
      %29 = vector.load %arg6[%c0_23, %c0_24] : memref<1x128xf32, #tpu.memory_space<vmem>>, vector<1x128xf32>
      %30 = vector.broadcast %29 : vector<1x128xf32> to vector<16x128xf32>
      %31 = arith.addf %28, %30 : vector<16x128xf32>
      %c0_25 = arith.constant 0 : index
      %c0_26 = arith.constant 0 : index
      %c0_27 = arith.constant 0 : index
      %32 = vector.load %arg7[%c0_25, %c0_26, %c0_27] : memref<1x16x128xf32, #tpu.memory_space<vmem>>, vector<1x16x128xf32>
      %33 = vector.shape_cast %32 : vector<1x16x128xf32> to vector<16x128xf32>
      %34 = vector.shape_cast %31 : vector<16x128xf32> to vector<1x16x128xf32>
      tpu.vector_store %arg7[%c0_25, %c0_26, %c0_27], %34 {strides = array<i32>} : memref<1x16x128xf32, #tpu.memory_space<vmem>>, vector<1x16x128xf32>,
    } else {
    }
    return
  }
  func.func @transform_0(%arg0: i32, %arg1: i32, %arg2: i32) -> (i32, i32, i32, i32) {
    %c0_i32 = arith.constant 0 : i32
    %c0_i32_0 = arith.constant 0 : i32
    return %arg0, %arg2, %arg1, %c0_i32 : i32, i32, i32, i32
  }
  func.func @transform_1(%arg0: i32, %arg1: i32, %arg2: i32) -> (i32, i32, i32) {
    %c0_i32 = arith.constant 0 : i32
    %c0_i32_0 = arith.constant 0 : i32
    %c0_i32_1 = arith.constant 0 : i32
    return %arg0, %c0_i32, %c0_i32_0 : i32, i32, i32
  }
  func.func @transform_2(%arg0: i32, %arg1: i32, %arg2: i32) -> (i32, i32, i32) {
    %c0_i32 = arith.constant 0 : i32
    %c0_i32_0 = arith.constant 0 : i32
    %c0_i32_1 = arith.constant 0 : i32
    return %arg2, %c0_i32, %c0_i32_0 : i32, i32, i32
  }
  func.func @transform_3(%arg0: i32, %arg1: i32, %arg2: i32) -> (i32, i32) {
    %c0_i32 = arith.constant 0 : i32
    %c0_i32_0 = arith.constant 0 : i32
    %c0_i32_1 = arith.constant 0 : i32
    return %c0_i32, %c0_i32_0 : i32, i32
  }
  func.func @transform_4(%arg0: i32, %arg1: i32, %arg2: i32) -> (i32, i32, i32) {
    %c0_i32 = arith.constant 0 : i32
    %c0_i32_0 = arith.constant 0 : i32
    return %arg0, %arg1, %c0_i32 : i32, i32, i32
  }
}

</mosaic_0001>

<bundles_post_ra>
// kernel: relational_graph_conv.1
= control target key start
LH: loop header
LB: loop body
LE: loop exit
PB: predicated region body
PF: predicated region fallthrough
CT: control target
= control target key end

     0   :  { %9 = vsyncpa [#allocation4], 0  ;;  %s1256_s0 = inlined_call_operand.vmem [shape: bf16[2,3,32,32], index: 0, kind: input, shape index: {}]   ;;  %s1257_s1 = inlined_call_operand.vmem [shape: f32[2,32,32], index: 1, kind: input, shape index: {}]   ;;  %s1258_s2 = inlined_call_operand.vmem [shape: f32[3,32,128], index: 2, kind: input, shape index: {}]   ;;  %s1259_s3 = inlined_call_operand.vmem [shape: f32[1,128], index: 3, kind: input, shape index: {}]   ;;  %s1260_s4 = inlined_call_operand.hbm [shape: f32[2,32,128], index: 4, kind: output, shape index: {}]  }
   0x1   :  { %11 = vsyncpa [#allocation4 + $0x1], 0  ;;  %s1058_s15 = smov 0   ;;  %s1060_s16 = smov 0  }
   0x2   :  { %s1062_s17 = smov 0   ;;  %s1064_s18 = smov 0  }
   0x3   :  { %s1066_s19 = smov 0   ;;  %s1068_s20 = smov 0  }
   0x4   :  { %s1070_s21 = smov 0   ;;  %s1072_s22 = smov 0  }
   0x5   :  { %s1074_s23 = smov 0   ;;  %s1076_s24 = smov 0  }
   0x6 LB: > { %1272 = sst [smem:[#allocation6_spill]] %s987_s15  ;;  %s713_s25 = sadd.s32 4294967295, %s1023_s24   ;;  %s1023_s24 = sphi %s1076_s24, %s17_s24   ;;  %s1019_s23 = sphi %s1074_s23, %s1299_s23   ;;  %s1015_s22 = sphi %s1072_s22, %s1295_s22   ;;  %s1011_s21 = sphi %s1070_s21, %s1294_s21   ;;  %s1007_s20 = sphi %s1068_s20, %s1293_s20   ;;  %s1003_s19 = sphi %s1066_s19, %s1292_s19   ;;  %s999_s18 = sphi %s1064_s18, %s1291_s18   ;;  %s995_s17 = sphi %s1062_s17, %s1290_s17   ;;  %s991_s16 = sphi %s1060_s16, %s1298_s16   ;;  %s987_s15 = sphi %s1058_s15, %s1297_s15  }
   0x7   : > { %1273 = sst [smem:[#allocation7_spill]] %s995_s17  ;;  %s714_s26 = sadd.s32 4294967294, %s1023_s24  }
   0x8   : > { %1274 = sst [smem:[#allocation8_spill]] %s1011_s21  ;;  %s29_s27 = sadd.s32 1, %s1011_s21 }
   0x9   : > { %1275 = sst [smem:[#allocation9_spill]] %s1015_s22  ;;  %p30_p0 = scmp.ge.s32.totalorder %s29_s27, 3 }
   0xa   : > { %1276 = sst [smem:[#allocation10_spill]] %s1019_s23  ;;  %s32_s28 = sadd.s32 1, %s1015_s22 }
   0xb   : > { %1277 = sst [smem:[#allocation11_spill]] %s1023_s24  ;;  %s36_s29 = sadd.s32 1, %s1019_s23 }
   0xc   : > { %p158_p1 = scmp.ne.s32.totalorder %s995_s17, %s991_s16  ;;  %s1301_s27 = smov (%p30_p0, %s29_s27), 0 }
   0xd   : > { %1278 = sst [smem:[#allocation12_spill]] %s1301_s27  ;;  %s1303_s28 = smov (!%p30_p0, %s32_s28), %s1015_s22 }
   0xe   : > { %p159_p2 = scmp.eq.s32.totalorder %s713_s25, 11  ;;  %p164_p3 = scmp.ne.s32.totalorder %s991_s16, %s987_s15 }
   0xf   : > { %p34_p4 = scmp.ge.s32.totalorder %s1303_s28, 2  ;;  %p165_p5 = scmp.eq.s32.totalorder %s714_s26, 11 }
  0x10   : > { %p1120_p6 = por %p159_p2, %p158_p1  ;;  %p717_p8 = scmp.ge.s32.totalorder %s1023_s24, 1 }
  0x11   : > { %s1305_s28 = smov (%p34_p4, %s1303_s28), 0  ;;  %s1307_s29 = smov (!%p34_p4, %s36_s29), %s1019_s23 }
  0x12   : > { %1280 = sst [smem:[#allocation13_spill]] %s1305_s28  ;;  %p1127_p7 = por %p165_p5, %p164_p3 }
  0x13   : > { %p38_p9 = scmp.ge.s32.totalorder %s1307_s29, 2  ;;  %p219_p10 = scmp.lt.s32.totalorder %s1023_s24, 13 }
  0x14   : > { %s1281_s5 = scalar_select %p1127_p7, 1, 0 }
  0x15   : > { %s144_s6 = ssub.s32 %s1015_s22, %s1305_s28  ;;  %s1309_s29 = smov (%p38_p9, %s1307_s29), 0 }
  0x16   : > { %1282 = sst [smem:[#allocation14_spill]] %s1281_s5  ;;  %p220_p11 = pnand %p717_p8, %p219_p10 }
  0x17   : > { %1283 = sst [smem:[#allocation15_spill]] %s1309_s29  ;;  %s143_s7 = ssub.s32 %s1019_s23, %s1309_s29 }
  0x18   : > { %s145_s8 = sor.u32 %s144_s6, %s143_s7  ;;  %s148_s9 = sadd.s32 1, %s995_s17 }
  0x19   : > { %p146_p12 = scmp.eq.s32.totalorder %s145_s8, 0  ;;  %223 = sbr.rel (%p220_p11) target bundleno = 533 (0x215), region = 36 }
  0x1a   : > { %s1265_s11 = sand.u32 (!%p220_p11), 1, %s991_s16   ;;  %s1145_s12 = sshll.u32 (!%p220_p11), %s1003_s19, 1 }
  0x1b   : > { %s1141_s10 = scalar_select %p146_p12, %s995_s17, %s148_s9  }
  0x1c   : > { %s718_s13 = sshll.u32 (!%p220_p11), %s1265_s11, 4  ;;  %p264_p13 = scmp.lt.s32.totalorder (!%p220_p11), %s1007_s20, 1 }
  0x1d   : > { %1284 = sst [smem:[#allocation16_spill]] %s1141_s10  ;;  %p266_p0 = scmp.lt.s32.totalorder (!%p220_p11), %s999_s18, 2 }
  0x1e   : > { %p268_p1 = scmp.lt.s32.totalorder (!%p220_p11), %s1145_s12, 3  ;;  %s1166_s24 = scalar_lea.vmem (!%p220_p11), [#allocation3], %s718_s13 }
  0x1f   : > { %p726_p2 = scmp.ne.s32.totalorder (!%p220_p11), %s999_s18, 0 }
  0x20   : > { %s265_s14 = scalar_select %p264_p13, %s1007_s20, 1 }
  0x21   : > { %s267_s25 = scalar_select %p266_p0, %s999_s18, 2 }
  0x22   : > { %s811_s26 = smul.u32 12, %s265_s14  ;;  %s743_s7 = sshll.u32 %s265_s14, 5  ;;  %v1025_v0 = vmov (!%p726_p2), 0.0  }
  0x23   : > { %s720_s6 = sshll.u32 %s267_s25, 2  ;;  %s1158_s28 = scalar_lea.vmem %s1257_s1, %s743_s7  ;;  %294 = vst [vmem:[#allocation2] sm:$0xff] (!%p726_p2), %v1025_v0  ;;  %295 = vst [vmem:[#allocation2 + $0x8] sm:$0xff] (!%p726_p2), %v1025_v0 }
  0x24   : > { %s269_s8 = scalar_select %p268_p1, %s1145_s12, 3 }
  0x25   : > { %s744_s19 = sshll.u32 %s267_s25, 5  ;;  %293 = sbr.rel (%p726_p2) target bundleno = 44 (0x2c), region = 40 }
  0x26   : > { %s271_s27 = sadd.s32 %s720_s6, %s269_s8  ;;  %s286_s11 = scalar_lea.vmem %s1258_s2, %s744_s19 }
  0x27   : > { %s273_s21 = sadd.s32 %s811_s26, %s271_s27 }
  0x28   : > { %s721_s10 = sshll.u32 %s273_s21, 2 }
  0x29   : > { %s275_s15 = scalar_lea.vmem %s1256_s0, %s721_s10 }
  0x2c PF: > { %v302_v1 = vld [vmem:[%s286_s11] sm:$0xff]  ;;  %v303_v2 = vld [vmem:[%s286_s11 + $0x8] sm:$0xff]  ;;  %v304_v3 = vld [vmem:[%s286_s11 + $0x10] sm:$0xff]  ;;  %vm311_vm0 = vcmask 261120   ;;  %v1026_v7 = vmov 0.0   ;;  %vm1027_vm1 = vmmov 0  }
  0x2d   : > { %v795_v4 = vpack.c.bf16 %v303_v2, %v302_v1  ;;  %v305_v5 = vld [vmem:[%s286_s11 + $0x18] sm:$0xff]  ;;  %v298_v6 = vld [vmem:[%s1158_s28] sm:$0xff]  ;;  %762 = vmatprep.subr.bf16.mxu0 %v1026_v7  ;;  %766 = vmatprep.mubr.msk.bf16.mxu0 %vm1027_vm1, %v1026_v7  ;;  %v1028_v9 = vmov 1065369472   ;;  %v299_v11 = vld [vmem:[%s1158_s28 + $0x8] sm:$0xff]  ;;  %v1029_v15 = vmov 0  }
  0x2e   : > { %v799_v8 = vpack.c.bf16 %v305_v5, %v304_v3  ;;  %778 = vmatprep.mubr.msk.f32.mxu1 %vm311_vm0, %v298_v6  ;;  %763 = vmatpush3.bf16.msra.mxu0 %v1028_v9  ;;  %v296_v10 = vld [vmem:[%s275_s15] sm:$0xff]   ;;  %v300_v12 = vld [vmem:[%s1158_s28 + $0x10] sm:$0xff]  ;;  %v301_v13 = vld [vmem:[%s1158_s28 + $0x18] sm:$0xff]  ;;  %p735_p3 = scmp.ne.s32.totalorder %s999_s18, 2 }
  0x2f   : > { %796 = vmatprep.subr.bf16.mxu1 %v795_v4  ;;  %764 = vmatprep.subr.bf16.mxu0 %v1026_v7  ;;  %v364_v14 = vunpack.c.l.bf16 %v296_v10  ;;  %v365_v26 = vunpack.c.h.bf16 %v296_v10  ;;  %v545_v34 = vld [vmem:[#allocation2 + $0x8] sm:$0xff]  ;;  %v544_v37 = vld [vmem:[#allocation2] sm:$0xff] }
  0x30   : > { %798 = vmatpush3.bf16.msra.mxu1 %v795_v4  ;;  %906 = vset.pattern.permute.xlu0 %v1029_v15  ;;  %v736_v42 = vld [vmem:[%s1259_s3] ss:$0 sm:$0xff] (!%p735_p3) }
  0x31   : > { %800 = vmatprep.subr.bf16.mxu1 %v799_v8 }
  0x32   : > { %765 = vmatpush3.bf16.msra.mxu0 %v1028_v9 }
  0x34   : > { %802 = vmatpush3.bf16.msra.mxu1 %v799_v8 }
  0x35   : > { %767 = vmatmul.mubr.msk.bf16.vlgmr.msra.gmra.mrb[0].mxu0 %vm311_vm0, %v296_v10 }
  0x36   : > { %792 = vmatprep.mubr.msk.f32.mxu0 %vm311_vm0, %v364_v14 }
  0x37   : > { %779 = vmatmul.mubr.msk.f32.vlgmr.msra.gmra.mrb[0].mxu1 %vm311_vm0, %v299_v11 }
  0x38   : > { %781 = vmatprep.mubr.msk.f32.mxu1 %vm311_vm0, %v300_v12 }
  0x3b   : > { %782 = vmatmul.mubr.msk.f32.gmra.mrb[2].mxu1 %vm311_vm0, %v301_v13 }
 0x108   : > { %v349_v16 = vpop.f32.mrb[0].mxu0 }
 0x109   : > { %909 = vrcp.f32 %v349_v16  ;;  %v768_v17 = vpop.f32.mrb[1].mxu0  ;;  %vm356_vm2 = vcmp.eq.f32.partialorder %v349_v16, 0.0 }
 0x10a   : > { %v780_v18 = vpop.f32.mrb[0].mxu1  ;;  %v352_v19 = vpop.f32.mrb[2].mxu0 }
 0x10b   : > { %v444_v20 = vpop.f32.mrb[1].mxu1  ;;  %911 = vrcp.f32 %v352_v19  ;;  %v769_v21 = vpop.f32.mrb[3].mxu0  ;;  %vm357_vm3 = vcmp.eq.f32.partialorder %v352_v19, 0.0 }
 0x10c   : > { %v803_v22 = vpack.c.bf16 %v780_v18, %v444_v20 }
 0x10e   : > { %v783_v23 = vpop.f32.mrb[2].mxu1  ;;  %804 = vmatprep.subr.bf16.mxu0 %v803_v22 }
 0x10f   : > { %v454_v24 = vpop.f32.mrb[3].mxu1  ;;  %806 = vmatpush3.bf16.msra.mxu0 %v803_v22 }
 0x110   : > { %v807_v25 = vpack.c.bf16 %v783_v23, %v454_v24 }
 0x112   : > { %808 = vmatprep.subr.bf16.mxu0 %v807_v25 }
 0x113   : > { %v910_v27 = vpop.eup %909  ;;  %810 = vmatpush3.bf16.msra.mxu0 %v807_v25 }
 0x114   : > { %v362_v28 = vsel %vm356_vm2, 0.0, %v910_v27 }
 0x115   : > { %v912_v29 = vpop.eup %911  ;;  %548 = vperm.xlu0 %906, %v362_v28  }
 0x116   : > { %793 = vmatmul.mubr.msk.f32.vlgmr.msra.gmra.mrb[4].mxu0 %vm311_vm0, %v365_v26  ;;  %v363_v30 = vsel %vm357_vm3, 0.0, %v912_v29 }
 0x119   : > { %553 = vperm.xlu0 %906, %v363_v30  }
 0x194   : > { %v549_v31 = vpop.permute.xlu0 %548 }
 0x198   : > { %v554_v32 = vpop.permute.xlu0 %553 }
 0x1e9   : > { %v794_v33 = vpop.f32.mrb[4].mxu0  ;;  %565 = sbr.rel (%p735_p3) target bundleno = 506 (0x1fa), region = 44 }
 0x1ea   : > { %v557_v35 = vmul.f32 %v794_v33, %v554_v32  ;;  %v535_v36 = vpop.f32.mrb[5].mxu0 }
 0x1eb   : > { %v556_v38 = vmul.f32 %v549_v31, %v535_v36 }
 0x1ec   : > { %v559_v39 = vadd.f32 %v557_v35, %v545_v34 }
 0x1ed   : > { %v558_v40 = vadd.f32 %v556_v38, %v544_v37 }
 0x1ee   : > { %561 = vst [vmem:[#allocation2 + $0x8] sm:$0xff] %v559_v39 }
 0x1ef   : > { %560 = vst [vmem:[#allocation2] sm:$0xff] %v558_v40 }
 0x1f5   : > { %v567_v43 = vld [vmem:[#allocation2 + $0x8] sm:$0xff] }
 0x1f6   : > { %v566_v41 = vld [vmem:[#allocation2] sm:$0xff]  ;;  %v576_v45 = vadd.f32 %v736_v42, %v567_v43 }
 0x1f7   : > { %v575_v44 = vadd.f32 %v736_v42, %v566_v41 }
 0x1f8   : > { %578 = vst [vmem:[%s1166_s24 + $0x8] sm:$0xff] %v576_v45 }
 0x1f9   : > { %577 = vst [vmem:[%s1166_s24] sm:$0xff] %v575_v44 }
 0x1fa PF: > { %s739_s18 = sshll.u32 %s1007_s20, 2  ;;  %s595_s22 = sshll.u32 %s1166_s24, 4  ;;  %s1189_s22 = int_to_ptr.vmem [resolvable:$true] %s595_s22 }
 0x1fb   : > { %s592_s21 = sadd.s32 %s739_s18, %s1145_s12  ;;  %s1285_s5 = sand.u32 1, %s991_s16  }
 0x1fc   : > { %s740_s23 = sshll.u32 %s592_s21, 7  ;;  %s1198_s10 = scalar_lea.sflag [#allocation4], %s1285_s5 }
 0x1fd   : > { %s1194_s29 = scalar_lea.hbm %s1260_s4, %s740_s23  ;;  %s913_s11 = scalar_lea.vmem %s1189_s22, 256 }
 0x1fe   : > { %p914_p4 = scmp.ne.s32.totalorder %s1189_s22, %s913_s11  ;;  %s1030_s20 = smov [#allocation3]  }
 0x1ff   : > { %s917_s24 = sshll.u32 %s1030_s20, 4  ;;  %s918_s24 = int_to_ptr.vmem [resolvable:$false] %s917_s24 }
 0x200   : > { %p915_p5 = pnand %p914_p4, %p1120_p6  ;;  %s919_s12 = scalar_lea.vmem %s918_s24, 512 }
 0x201   : > { %p920_p9 = scmp.lt.s32.totalorder %s1189_s22, %s918_s24  ;;  %p921_p10 = scmp.lt.s32.totalorder %s919_s12, %s913_s11 }
 0x202   : > { %p916_p8 = pneg %p915_p5 }
 0x203   : > { %p922_p11 = por %p921_p10, %p920_p9 }
 0x205   : > { %p923_p12 = pnand %p922_p11, %p916_p8 }
 0x207   : > { %926 = shalt.err (!%p923_p12)
}
 0x208   : > { %s927_s13 = scalar_lea.hbm %s1194_s29, 256  ;;  %s931_s26 = scalar_lea.hbm %s1260_s4, 1024 }
 0x209   : > { %p928_p13 = scmp.ne.s32.totalorder %s1194_s29, %s927_s13  ;;  %p932_p2 = scmp.lt.u32.totalorder %s1194_s29, %s1260_s4 }
 0x20a   : > { %p933_p3 = scmp.lt.u32.totalorder %s931_s26, %s927_s13  ;;  %p935_p5 = scmp.lt.u32.totalorder %s927_s13, %s1194_s29 }
 0x20b   : > { %p929_p0 = pnand %p928_p13, %p1120_p6 }
 0x20c   : > { %p934_p4 = por %p933_p3, %p932_p2 }
 0x20d   : > { %p930_p1 = pneg %p929_p0 }
 0x20e   : > { %p936_p8 = por %p935_p5, %p934_p4 }
 0x210   : > { %p937_p9 = pnand %p936_p8, %p930_p1 }
 0x212   : > { %940 = shalt.err (!%p937_p9)
}
 0x213   : > { %s1031_s8 = smov 128   ;;  %s1032_s9 = smov 8  }
 0x214   : > { %812 = dma.vmem_to_hbm [thread:$0]  (%p1120_p6), %s1189_s22, 256, %s1194_s29, %s1198_s10, %s1031_s8, %s1031_s8, %s1032_s9  }
 0x215 PF: > { %s1286_s19 = sld [smem:[#allocation11_spill]]  ;;  %s1287_s15 = sld [smem:[#allocation6_spill]] }
 0x21b   : > { %p818_p10 = scmp.ge.s32.totalorder %s1286_s19, 2  ;;  %s610_s18 = sand.u32 1, %s1287_s15  }
 0x21c   : > { %s611_s21 = scalar_lea.sflag [#allocation4], %s610_s18 }
 0x21d   : > { %p815_p11 = pnand %p818_p10, %p1127_p7 }
 0x21f   : > { %982 = dma.done.wait (!%p815_p11), %s611_s21, 256  }
 0x220   : > { %984 = vsyncadd (!%p815_p11), %s611_s21, 4294967040  ;;  %s17_s24 = sadd.s32 1, %s1286_s19   ;;  %s1289_s23 = sld [smem:[#allocation7_spill]] }
 0x221   : > { %p14_p12 = scmp.ge.s32.totalorder %s17_s24, 14   ;;  %s1290_s17 = sld [smem:[#allocation16_spill]] }
 0x222   : > { %s1291_s18 = sld [smem:[#allocation8_spill]]  ;;  %s1292_s19 = sld [smem:[#allocation9_spill]] }
 0x223   : > { %s1293_s20 = sld [smem:[#allocation10_spill]]  ;;  %s1294_s21 = sld [smem:[#allocation12_spill]] }
 0x224   : > { %s1295_s22 = sld [smem:[#allocation13_spill]]  ;;  %s1296_s30 = sld [smem:[#allocation15_spill]] }
 0x225   : > { %s1297_s15 = smov %s991_s16  ;;  %16 = sbr.rel (!%p14_p12) target bundleno = 6 (0x6), region = 85 }
 0x226   : > { %s1298_s16 = smov %s1289_s23 }
 0x22a   : > { %s1299_s23 = smov %s1296_s30 }
 0x22c   :  { %616 = vsyncpa [#allocation4], 1 }
 0x22d   :  { %618 = vsyncpa [#allocation4 + $0x1], 1 }

</bundles_post_ra>
